<compile_context>
chip_gen: v6e
topology: v6e:2x2x1
jax: 0.10.0
libtpu: 0.0.40
codegen_flags: <defaults>
</compile_context>

<pallas_src>
import jax
import jax.numpy as jnp
from jax.experimental import pallas as pl
from jax.experimental.pallas import tpu as pltpu

# CartPole-like environment dims (env.observation_space.shape[0], env.action_space.n)
N_STATES = 4
N_ACTIONS = 2
HIDDEN = 10


def _cdiv(a, b):
    return -(-a // b)


# ----------------------------------------------------------------------------
# Packed-parameter slab: 6 sections of 16 rows each, 16 lanes wide (f32).
# Sections start at sublane-aligned rows; unused entries are zero and the kernel
# relies on that (it reads padded 16/8-row sections).
# ----------------------------------------------------------------------------
_SECT = 16
PACK_ROWS = 6 * _SECT  # 96
PACK_COLS = 16
_W1_R, _B1_R, _W2_R, _B2_R, _W3_R, _B3_R = (i * _SECT for i in range(6))
_A_PAD = 8 * _cdiv(N_ACTIONS, 8)  # padded action rows for the w3/b3 section reads
assert HIDDEN <= _SECT and N_ACTIONS <= _SECT and N_STATES <= PACK_COLS

# Tile-selection policy (see header comment).
_SMALL_BATCH = 64       # below this: plain-XLA fast path, no pallas_call
_SINGLE_TILE_MAX = 2048  # up to this many (128-padded) lanes: one grid step
_MAX_TILE = 8192         # cap per-step tile (review: 2048-8192 range)
_TARGET_STEPS = 8        # >=2 steps for dual-TC v7x, <=8 to bound per-step overhead


def _choose_tile(batch):
    """Return (tile_b, b_pad): lane-tile width (multiple of 128/256) and padded batch."""
    b128 = 128 * _cdiv(max(batch, 1), 128)
    if b128 <= _SINGLE_TILE_MAX:
        return b128, b128                      # single grid step
    steps = min(_TARGET_STEPS, _cdiv(b128, _SINGLE_TILE_MAX))
    tile = 256 * _cdiv(_cdiv(b128, steps), 256)
    tile = min(tile, _MAX_TILE)
    b_pad = tile * _cdiv(b128, tile)
    return tile, b_pad


def _net_kernel(p_ref, xt_ref, out_ref):
    """p_ref:  (PACK_ROWS, PACK_COLS) packed params, VMEM-resident across steps.
    xt_ref: (N_STATES, TILE_B) transposed state tile (batch on lanes).
    out_ref:(N_ACTIONS, TILE_B) transposed log-prob tile (lane-dense store)."""
    x_t = xt_ref[...]  # (N_STATES, TILE_B) f32

    # Full sublane-aligned sections (zero-padded rows/cols are numerically inert).
    w1 = p_ref[_W1_R:_W1_R + _SECT, 0:N_STATES]   # (16, 4)   rows >=HIDDEN are zero
    b1 = p_ref[_B1_R:_B1_R + _SECT, 0:1]          # (16, 1)
    w2 = p_ref[_W2_R:_W2_R + _SECT, 0:_SECT]      # (16, 16)
    b2 = p_ref[_B2_R:_B2_R + _SECT, 0:1]          # (16, 1)
    w3 = p_ref[_W3_R:_W3_R + _A_PAD, 0:_SECT]     # (8, 16)   rows >=N_ACTIONS are zero
    b3 = p_ref[_B3_R:_B3_R + _A_PAD, 0:1]         # (8, 1)

    # Transposed forward pass: features on sublanes, batch on lanes.
    # (Padding HIDDEN 10->16 rows costs no extra vregs: 10 rows already span 2 sublane tiles.)
    h1 = jnp.tanh(jnp.dot(w1, x_t, preferred_element_type=jnp.float32) + b1)   # (16, TILE_B)
    h2 = jnp.tanh(jnp.dot(w2, h1, preferred_element_type=jnp.float32) + b2)    # (16, TILE_B)
    logits = jnp.dot(w3, h2, preferred_element_type=jnp.float32) + b3          # (8, TILE_B)

    if N_ACTIONS == 2:
        # Closed-form 2-class log-sum-exp: pure elementwise VPU/EUP work,
        # no cross-lane reduction over the padded lane axis.
        l0 = logits[0:1, :]
        l1 = logits[1:2, :]
        m = jnp.maximum(l0, l1)
        lse = m + jnp.log(1.0 + jnp.exp(-jnp.abs(l0 - l1)))   # (1, TILE_B)
    else:
        lg = logits[0:N_ACTIONS, :]
        m = jnp.max(lg, axis=0, keepdims=True)
        lse = m + jnp.log(jnp.sum(jnp.exp(lg - m), axis=0, keepdims=True))

    out_ref[...] = (logits[0:N_ACTIONS, :] - lse).astype(out_ref.dtype)  # lane-dense store


def pack_params(params):
    """Pack (w1,b1,w2,b2,w3,b3) [PyTorch layout: w=[out,in], b=[out]] into one
    (PACK_ROWS, PACK_COLS) f32 slab with sublane-aligned, zero-padded sections."""
    w1, b1, w2, b2, w3, b3 = params
    p = jnp.zeros((PACK_ROWS, PACK_COLS), jnp.float32)
    p = p.at[_W1_R:_W1_R + HIDDEN, 0:N_STATES].set(w1.astype(jnp.float32))
    p = p.at[_B1_R:_B1_R + HIDDEN, 0].set(b1.astype(jnp.float32))
    p = p.at[_W2_R:_W2_R + HIDDEN, 0:HIDDEN].set(w2.astype(jnp.float32))
    p = p.at[_B2_R:_B2_R + HIDDEN, 0].set(b2.astype(jnp.float32))
    p = p.at[_W3_R:_W3_R + N_ACTIONS, 0:HIDDEN].set(w3.astype(jnp.float32))
    p = p.at[_B3_R:_B3_R + N_ACTIONS, 0].set(b3.astype(jnp.float32))
    return p


def _small_forward(x, p):
    """Plain-XLA fast path for tiny (per-env-step) batches, reading the packed slab."""
    x = jnp.asarray(x, jnp.float32)
    w1 = p[_W1_R:_W1_R + HIDDEN, 0:N_STATES]
    b1 = p[_B1_R:_B1_R + HIDDEN, 0]
    w2 = p[_W2_R:_W2_R + HIDDEN, 0:HIDDEN]
    b2 = p[_B2_R:_B2_R + HIDDEN, 0]
    w3 = p[_W3_R:_W3_R + N_ACTIONS, 0:HIDDEN]
    b3 = p[_B3_R:_B3_R + N_ACTIONS, 0]
    h1 = jnp.tanh(x @ w1.T + b1)
    h2 = jnp.tanh(h1 @ w2.T + b2)
    logits = h2 @ w3.T + b3
    return jax.nn.log_softmax(logits, axis=-1)


def _forward_impl(x, params_packed, transposed_out):
    """x: [B, N_STATES] -> log-probs, either [B, N_ACTIONS] or [N_ACTIONS, B]."""
    batch = x.shape[0]

    if batch < _SMALL_BATCH:
        out = _small_forward(x, params_packed)          # (B, N_ACTIONS)
        return out.T if transposed_out else out

    tile_b, b_pad = _choose_tile(batch)
    num_tiles = b_pad // tile_b

    # Present the batch on the lane axis: single transpose + one fused pad.
    x_t = jnp.asarray(x, jnp.float32).T                 # (N_STATES, B)
    if b_pad != batch:
        x_t = jnp.pad(x_t, ((0, 0), (0, b_pad - batch)))

    out_t = pl.pallas_call(
        _net_kernel,
        out_shape=jax.ShapeDtypeStruct((N_ACTIONS, b_pad), jnp.float32),
        grid_spec=pltpu.PrefetchScalarGridSpec(
            num_scalar_prefetch=0,
            grid=(num_tiles,),
            in_specs=[
                # Packed params: constant index_map -> VMEM-resident across steps.
                pl.BlockSpec((PACK_ROWS, PACK_COLS), lambda i: (0, 0)),
                # Streamed state tiles, batch on the lane axis.
                pl.BlockSpec((N_STATES, tile_b), lambda i: (0, i)),
            ],
            out_specs=pl.BlockSpec((N_ACTIONS, tile_b), lambda i: (0, i)),
        ),
        compiler_params=pltpu.CompilerParams(
            dimension_semantics=("parallel",)),          # shard batch tiles across TCs (v7x)
    )(params_packed, x_t)

    out_t = out_t[:, :batch]                             # (N_ACTIONS, B)
    return out_t if transposed_out else out_t.T


# Public entry points (jitted so pad/transpose/pallas/slice fuse into one dispatch).
net_forward = jax.jit(lambda x, p: _forward_impl(x, p, transposed_out=False))
# Layout-preserving variant: returns (N_ACTIONS, B) so downstream loss/sampling can
# consume the lane-dense slab without an extra [2,B]->[B,2] transpose.
net_forward_t = jax.jit(lambda x, p: _forward_impl(x, p, transposed_out=True))


def init_params(key):
    """Match the PyTorch module init: weights ~ Normal(0, 0.1), biases = 0.1.
    Weights in PyTorch layout [out_features, in_features]."""
    k1, k2, k3 = jax.random.split(key, 3)
    w1 = (0.1 * jax.random.normal(k1, (HIDDEN, N_STATES))).astype(jnp.float32)
    b1 = jnp.full((HIDDEN,), 0.1, dtype=jnp.float32)
    w2 = (0.1 * jax.random.normal(k2, (HIDDEN, HIDDEN))).astype(jnp.float32)
    b2 = jnp.full((HIDDEN,), 0.1, dtype=jnp.float32)
    w3 = (0.1 * jax.random.normal(k3, (N_ACTIONS, HIDDEN))).astype(jnp.float32)
    b3 = jnp.full((N_ACTIONS,), 0.1, dtype=jnp.float32)
    return (w1, b1, w2, b2, w3, b3)


def reference_forward(x, params):
    """Plain-JAX reference (nn.Linear semantics: y = x @ W.T + b)."""
    w1, b1, w2, b2, w3, b3 = params
    x = jnp.asarray(x, jnp.float32)
    h1 = jnp.tanh(x @ w1.T + b1)
    h2 = jnp.tanh(h1 @ w2.T + b2)
    logits = h2 @ w3.T + b3
    return jax.nn.log_softmax(logits, axis=-1)


if __name__ == "__main__":
    key = jax.random.PRNGKey(0)
    pkey, xkey = jax.random.split(key)
    params = init_params(pkey)
    params_packed = pack_params(params)

    # Large batch: 2 grid steps of TILE_B=2048 (both TensorCores on v7x, amortized
    # per-step overhead on single-TC chips).
    B = 4096
    x = jax.random.normal(xkey, (B, N_STATES), dtype=jnp.float32)
    out = jax.block_until_ready(net_forward(x, params_packed))
    ref = reference_forward(x, params)
    assert out.shape == (B, N_ACTIONS)
    assert jnp.allclose(out, ref, atol=1e-5, rtol=1e-4), "mismatch vs JAX reference (B=4096)"
    assert jnp.allclose(jnp.sum(jnp.exp(out), axis=-1), 1.0, atol=1e-5)

    # Transposed-output variant (lane-dense layout for downstream consumers).
    out_t = jax.block_until_ready(net_forward_t(x, params_packed))
    assert out_t.shape == (N_ACTIONS, B)
    assert jnp.allclose(out_t, ref.T, atol=1e-5, rtol=1e-4)

    # Ragged mid-size batch: pads to a single 896-lane tile (one grid step).
    x_mid = jax.random.normal(jax.random.PRNGKey(1), (777, N_STATES), dtype=jnp.float32)
    out_mid = jax.block_until_ready(net_forward(x_mid, params_packed))
    assert jnp.allclose(out_mid, reference_forward(x_mid, params), atol=1e-5, rtol=1e-4)

    # Tiny per-env-step batch -> plain-XLA fast path (no Pallas launch latency).
    x_small = jax.random.normal(jax.random.PRNGKey(2), (3, N_STATES), dtype=jnp.float32)
    out_small = jax.block_until_ready(net_forward(x_small, params_packed))
    assert jnp.allclose(out_small, reference_forward(x_small, params), atol=1e-5, rtol=1e-4)

    print("KERNEL_OK")
</pallas_src>

<mosaic_0001>
module attributes {stable_mosaic.version = 11 : i64} {
  func.func @_net_kernel(%arg0: i32, %arg1: memref<96x16xf32, #tpu.memory_space<vmem>>, %arg2: memref<4x2048xf32, #tpu.memory_space<vmem>>, %arg3: memref<2x2048xf32, #tpu.memory_space<vmem>>) attributes {dimension_semantics = [#tpu.dimension_semantics<parallel>], iteration_bounds = array<i64: 2>, scalar_prefetch = 0 : i64, scratch_operands = 0 : i64, tpu.core_type = #tpu.core_type<tc>, window_params = [{pipeline_mode = #tpu.pipeline_mode<synchronous>, transform_indices = @transform_0, window_bounds = array<i64: 96, 16>}, {transform_indices = @transform_1, window_bounds = array<i64: 4, 2048>}, {transform_indices = @transform_2, window_bounds = array<i64: 2, 2048>}]} {
    %c0 = arith.constant 0 : index
    %c0_0 = arith.constant 0 : index
    %0 = vector.load %arg2[%c0, %c0_0] : memref<4x2048xf32, #tpu.memory_space<vmem>>, vector<4x2048xf32>
    %c0_1 = arith.constant 0 : index
    %c0_2 = arith.constant 0 : index
    %1 = vector.load %arg1[%c0_1, %c0_2] : memref<96x16xf32, #tpu.memory_space<vmem>>, vector<16x4xf32>
    %c16 = arith.constant 16 : index
    %c0_3 = arith.constant 0 : index
    %2 = vector.load %arg1[%c16, %c0_3] : memref<96x16xf32, #tpu.memory_space<vmem>>, vector<16x1xf32>
    %c32 = arith.constant 32 : index
    %c0_4 = arith.constant 0 : index
    %3 = vector.load %arg1[%c32, %c0_4] : memref<96x16xf32, #tpu.memory_space<vmem>>, vector<16x16xf32>
    %c48 = arith.constant 48 : index
    %c0_5 = arith.constant 0 : index
    %4 = vector.load %arg1[%c48, %c0_5] : memref<96x16xf32, #tpu.memory_space<vmem>>, vector<16x1xf32>
    %c64 = arith.constant 64 : index
    %c0_6 = arith.constant 0 : index
    %5 = vector.load %arg1[%c64, %c0_6] : memref<96x16xf32, #tpu.memory_space<vmem>>, vector<8x16xf32>
    %c80 = arith.constant 80 : index
    %c0_7 = arith.constant 0 : index
    %6 = vector.load %arg1[%c80, %c0_7] : memref<96x16xf32, #tpu.memory_space<vmem>>, vector<8x1xf32>
    %cst = arith.constant dense<0.000000e+00> : vector<16x2048xf32>
    %7 = tpu.matmul %1, %0, %cst {dimension_numbers = #tpu.dot_dimension_numbers<[1], [0], [0], [1], [0, 0, 1, 1], [], []>} : vector<16x4xf32>, vector<4x2048xf32>, vector<16x2048xf32> -> vector<16x2048xf32>
    %8 = vector.broadcast %2 : vector<16x1xf32> to vector<16x2048xf32>
    %9 = arith.addf %7, %8 : vector<16x2048xf32>
    %10 = math.tanh %9 : vector<16x2048xf32>
    %cst_8 = arith.constant dense<0.000000e+00> : vector<16x2048xf32>
    %11 = tpu.matmul %3, %10, %cst_8 {dimension_numbers = #tpu.dot_dimension_numbers<[1], [0], [0], [1], [0, 0, 1, 1], [], []>} : vector<16x16xf32>, vector<16x2048xf32>, vector<16x2048xf32> -> vector<16x2048xf32>
    %12 = vector.broadcast %4 : vector<16x1xf32> to vector<16x2048xf32>
    %13 = arith.addf %11, %12 : vector<16x2048xf32>
    %14 = math.tanh %13 : vector<16x2048xf32>
    %cst_9 = arith.constant dense<0.000000e+00> : vector<8x2048xf32>
    %15 = tpu.matmul %5, %14, %cst_9 {dimension_numbers = #tpu.dot_dimension_numbers<[1], [0], [0], [1], [0, 0, 1, 1], [], []>} : vector<8x16xf32>, vector<16x2048xf32>, vector<8x2048xf32> -> vector<8x2048xf32>
    %16 = vector.broadcast %6 : vector<8x1xf32> to vector<8x2048xf32>
    %17 = arith.addf %15, %16 : vector<8x2048xf32>
    %18 = vector.extract_strided_slice %17 {offsets = [0, 0], sizes = [1, 2048], strides = [1, 1]} : vector<8x2048xf32> to vector<1x2048xf32>
    %19 = vector.extract_strided_slice %17 {offsets = [1, 0], sizes = [1, 2048], strides = [1, 1]} : vector<8x2048xf32> to vector<1x2048xf32>
    %20 = arith.maximumf %18, %19 : vector<1x2048xf32>
    %21 = arith.subf %18, %19 : vector<1x2048xf32>
    %22 = math.absf %21 : vector<1x2048xf32>
    %cst_10 = arith.constant 0.000000e+00 : f32
    %23 = vector.broadcast %cst_10 : f32 to vector<1x2048xf32>
    %24 = arith.subf %23, %22 : vector<1x2048xf32>
    %25 = math.exp %24 : vector<1x2048xf32>
    %cst_11 = arith.constant 1.000000e+00 : f32
    %26 = vector.broadcast %cst_11 : f32 to vector<1x2048xf32>
    %27 = arith.addf %26, %25 : vector<1x2048xf32>
    %28 = math.log %27 : vector<1x2048xf32>
    %29 = arith.addf %20, %28 : vector<1x2048xf32>
    %30 = vector.extract_strided_slice %17 {offsets = [0, 0], sizes = [2, 2048], strides = [1, 1]} : vector<8x2048xf32> to vector<2x2048xf32>
    %31 = vector.broadcast %29 : vector<1x2048xf32> to vector<2x2048xf32>
    %32 = arith.subf %30, %31 : vector<2x2048xf32>
    %c0_12 = arith.constant 0 : index
    %c0_13 = arith.constant 0 : index
    %33 = vector.load %arg3[%c0_12, %c0_13] : memref<2x2048xf32, #tpu.memory_space<vmem>>, vector<2x2048xf32>
    tpu.vector_store %arg3[%c0_12, %c0_13], %32 {strides = array<i32>} : memref<2x2048xf32, #tpu.memory_space<vmem>>, vector<2x2048xf32>,
    return
  }
  func.func @transform_0(%arg0: i32) -> (i32, i32) {
    %c0_i32 = arith.constant 0 : i32
    %c0_i32_0 = arith.constant 0 : i32
    %c0_i32_1 = arith.constant 0 : i32
    return %c0_i32, %c0_i32_0 : i32, i32
  }
  func.func @transform_1(%arg0: i32) -> (i32, i32) {
    %c0_i32 = arith.constant 0 : i32
    %c0_i32_0 = arith.constant 0 : i32
    return %c0_i32, %arg0 : i32, i32
  }
  func.func @transform_2(%arg0: i32) -> (i32, i32) {
    %c0_i32 = arith.constant 0 : i32
    %c0_i32_0 = arith.constant 0 : i32
    return %c0_i32, %arg0 : i32, i32
  }
}

</mosaic_0001>

<bundles_post_ra>
// kernel: _lambda_.1
= control target key start
LH: loop header
LB: loop body
LE: loop exit
PB: predicated region body
PF: predicated region fallthrough
CT: control target
= control target key end

     0   :  { %7 = vsyncpa [#allocation3], 0  ;;  %s3634_s0 = inlined_call_operand.vmem [shape: f32[96,16], index: 0, kind: input, shape index: {}]   ;;  %s3635_s1 = inlined_call_operand.hbm [shape: f32[4,4096], index: 1, kind: input, shape index: {}]   ;;  %s3636_s2 = inlined_call_operand.hbm [shape: f32[2,4096], index: 2, kind: output, shape index: {}]  }
   0x1   :  { %9 = vsyncpa [#allocation3 + $0x1], 0 }
   0x2   :  { %10 = vsyncpa [#allocation4], 0 }
   0x3   :  { %12 = vsyncpa [#allocation4 + $0x1], 0  ;;  %s3037_s9 = smov 0   ;;  %s3039_s10 = smov 0  }
   0x4   :  { %s3041_s11 = smov 0   ;;  %s3043_s12 = smov 0  }
   0x5 LB: > { %s3058_s13 = sadd.s32 4294967295, %s3015_s12   ;;  %s2600_s14 = sadd.s32 4294967294, %s3015_s12   ;;  %s3015_s12 = sphi %s3043_s12, %s3653_s12   ;;  %s3011_s11 = sphi %s3041_s11, %s3652_s11   ;;  %s3007_s10 = sphi %s3039_s10, %s3651_s10   ;;  %s3003_s9 = sphi %s3037_s9, %s3650_s9  }
   0x6   : > { %s3062_s15 = sadd.s32 1, %s3015_s12   ;;  %s46_s16 = sadd.s32 1, %s3011_s11 }
   0x7   : > { %s43_s17 = ssub.s32 %s3015_s12, %s3062_s15  ;;  %p53_p0 = scmp.ne.s32.totalorder %s3011_s11, %s3007_s10 }
   0x8   : > { %p44_p1 = scmp.eq.s32.totalorder %s43_s17, 0  ;;  %p54_p2 = scmp.eq.s32.totalorder %s3015_s12, 0 }
   0x9   : > { %p59_p3 = scmp.ne.s32.totalorder %s3007_s10, %s3003_s9  ;;  %p60_p4 = scmp.eq.s32.totalorder %s3058_s13, 0 }
   0xa   : > { %s3074_s18 = scalar_select %p44_p1, %s3011_s11, %s46_s16  }
   0xb   : > { %p3076_p5 = por %p54_p2, %p53_p0  ;;  %p3080_p6 = por %p60_p4, %p59_p3 }
   0xc   : > { %p83_p7 = scmp.eq.s32.totalorder %s3058_s13, 1  ;;  %p89_p8 = scmp.eq.s32.totalorder %s2600_s14, 1 }
   0xd   : > { %s3640_s20 = scalar_select %p3080_p6, 1, 0 }
   0xe   : > { %p2684_p10 = scmp.lt.s32.totalorder %s3015_s12, 2  ;;  %p3087_p11 = por %p83_p7, %p53_p0 }
   0xf   : > { %p3091_p12 = por %p89_p8, %p59_p3  ;;  %s112_s23 = sand.u32 1, %s3011_s11  }
  0x10   : > { %s3641_s21 = scalar_select %p3087_p11, 1, 0 }
  0x11   : > { %s3642_s22 = scalar_select %p3091_p12, 1, 0 }
  0x12   : > { %s2670_s24 = sshll.u32 %s3015_s12, 10  ;;  %s2603_s25 = sshll.u32 %s112_s23, 6 }
  0x13   : > { %s3100_s28 = scalar_lea.hbm %s3635_s1, %s2670_s24  ;;  %s116_s29 = scalar_lea.vmem [#allocation2], %s2603_s25 }
  0x14   : > { %s124_s30 = sshll.u32 %s116_s29, 4  ;;  %p3104_p13 = pnand %p2684_p10, %p3076_p5  ;;  %s3108_s30 = int_to_ptr.vmem [resolvable:$true] %s124_s30 }
  0x15   : > { %s113_s4 = scalar_lea.sflag [#allocation3], %s112_s23  ;;  %s2923_s5 = scalar_lea.hbm %s3100_s28, 1024 }
  0x16   : > { %p2924_p2 = scmp.ne.s32.totalorder %s3100_s28, %s2923_s5  ;;  %p2925_p3 = pneg %p3104_p13 }
  0x17   : > { %s2928_s8 = scalar_lea.hbm %s3635_s1, 2048  ;;  %p2929_p5 = scmp.lt.s32.totalorder %s3100_s28, %s3635_s1 }
  0x18   : > { %p2926_p4 = pnand %p2925_p3, %p2924_p2  ;;  %p2930_p8 = scmp.lt.s32.totalorder %s2928_s8, %s2923_s5 }
  0x1a   : > { %p2927_p7 = pneg %p2926_p4  ;;  %p2931_p10 = por %p2930_p8, %p2929_p5 }
  0x1c   : > { %p2932_p9 = pnand %p2931_p10, %p2927_p7 }
  0x1e   : > { %2935 = shalt.err (!%p2932_p9)
}
  0x1f   : > { %s2936_s17 = scalar_lea.vmem %s3108_s30, 1024  ;;  %s3017_s19 = smov [#allocation2]  }
  0x20   : > { %p2937_p0 = scmp.ne.s32.totalorder %s3108_s30, %s2936_s17  ;;  %s2941_s23 = sshll.u32 %s3017_s19, 4  ;;  %s2942_s23 = int_to_ptr.vmem [resolvable:$false] %s2941_s23 }
  0x21   : > { %s2943_s24 = scalar_lea.vmem %s2942_s23, 2048  ;;  %p2944_p4 = scmp.lt.s32.totalorder %s3108_s30, %s2942_s23 }
  0x22   : > { %p2939_p1 = pnand %p2937_p0, %p2925_p3  ;;  %p2945_p12 = scmp.lt.s32.totalorder %s2943_s24, %s2936_s17 }
  0x24   : > { %p2940_p2 = pneg %p2939_p1  ;;  %p2946_p11 = por %p2945_p12, %p2944_p4 }
  0x26   : > { %p2947_p6 = pnand %p2946_p11, %p2940_p2 }
  0x28   : > { %2950 = shalt.err (!%p2947_p6)
}
  0x29   : > { %2679 = dma.hbm_to_vmem [thread:$0]  (!%p3104_p13), %s3100_s28, 1024, %s3108_s30, %s113_s4  }
  0x2a   : > { %p3644_p9 = scmp.lt.s32.totalorder %s3015_s12, 3  ;;  %p3645_p7 = scmp.ge.s32.totalorder %s3015_s12, 1 }
  0x2c   : > { %p130_p0 = pnand %p3645_p7, %p3644_p9 }
  0x2d   : > { %s3135_s25 = sand.u32 (!%p130_p0), 1, %s3007_s10   ;;  %p3646_p6 = scmp.ne.s32.totalorder (!%p130_p0), %s3640_s20, 0 }
  0x2e   : > { %133 = sbr.rel (%p130_p0) target bundleno = 790 (0x316), region = 28  ;;  %s2607_s26 = sshll.u32 (!%p130_p0), %s3135_s25, 6 }
  0x2f   : > { %s136_s27 = scalar_lea.sflag (!%p130_p0), [#allocation3], %s3135_s25  ;;  %s3139_s29 = scalar_lea.vmem (!%p130_p0), [#allocation2], %s2607_s26 }
  0x33   : > { %2994 = dma.done.wait (%p3646_p6), %s136_s27, 1024  }
  0x34   : > { %2996 = vsyncadd (%p3646_p6), %s136_s27, 4294966272  ;;  %v3018_v0 = vmov 0.0   ;;  %v3019_v1 = vmov 0   ;;  %v162_v2 = vld [vmem:[%s3139_s29] sm:$0xff]  ;;  %vm213_vm0 = vcmask 1043456   ;;  %v163_v3 = vld [vmem:[%s3139_s29 + $0x8] sm:$0xff] }
  0x35   : > { %310 = vmatprep.mubr.f32.mxu0 %v3018_v0  ;;  %387 = vmatprep.mubr.f32.mxu1 %v3018_v0  ;;  %v198_v4 = vcombine.high %v162_v2, %v162_v2  ;;  %v199_v5 = vcombine.high %v163_v3, %v163_v3  ;;  %v164_v6 = vld [vmem:[%s3139_s29 + $0x10] sm:$0xff]  ;;  %v165_v7 = vld [vmem:[%s3139_s29 + $0x18] sm:$0xff]  ;;  %v170_v8 = vld [vmem:[%s3634_s0] sm:$0xff]  ;;  %vm206_vm1 = vcmask 31744   ;;  %vm904_vm2 = vcmask 130048   ;;  %s2608_s30 = sshll.u32 %s3135_s25, 5 }
  0x36   : > { %2721 = vset.pattern.permute.xlu0 %v3019_v1  ;;  %2722 = vset.pattern.permute.xlu1 %v3019_v1  ;;  %v200_v9 = vcombine.high %v164_v6, %v164_v6  ;;  %v201_v10 = vcombine.high %v165_v7, %v165_v7  ;;  %v166_v11 = vld [vmem:[%s3139_s29 + $0x20] sm:$0xff]  ;;  %v167_v12 = vld [vmem:[%s3139_s29 + $0x28] sm:$0xff]  ;;  %v168_v16 = vld [vmem:[%s3139_s29 + $0x30] sm:$0xff]  ;;  %s3542_s3 = scalar_lea.vmem [#allocation5], %s2608_s30  ;;  %s2671_s4 = sshll.u32 %s3058_s13, 9 }
  0x37   : > { %2609 = vmatprep.subr.msk.mxu0 %vm213_vm0, %v198_v4  ;;  %2613 = vmatprep.subr.msk.mxu1 %vm213_vm0, %v199_v5  ;;  %v171_v13 = vld [vmem:[%s3634_s0 + $0x8] sm:$0xff]  ;;  %v202_v14 = vcombine.high %v166_v11, %v166_v11  ;;  %v203_v15 = vcombine.high %v167_v12, %v167_v12  ;;  %v169_v17 = vld [vmem:[%s3139_s29 + $0x38] sm:$0xff]  ;;  %v204_v19 = vcombine.high %v168_v16, %v168_v16  ;;  %v172_v21 = vld [vmem:[%s3634_s0 + $0x10] sm:$0xff]  ;;  %s2530_s5 = sshll.u32 %s3542_s3, 4  ;;  %s2528_s8 = scalar_lea.hbm %s3636_s2, %s2671_s4  ;;  %s2531_s5 = int_to_ptr.vmem [resolvable:$true] %s2530_s5 }
  0x38   : > { %2610 = vmatpush1.msk.msra.mxu0 %vm213_vm0, %v162_v2  ;;  %2614 = vmatpush1.msk.msra.mxu1 %vm213_vm0, %v163_v3  ;;  %v173_v18 = vld [vmem:[%s3634_s0 + $0x18] sm:$0xff]  ;;  %v205_v20 = vcombine.high %v169_v17, %v169_v17  ;;  %v179_v22 = vld [vmem:[%s3634_s0 + $0x50] sm:$0xff]  ;;  %s2516_s14 = scalar_lea.sflag [#allocation4], %s3135_s25  ;;  %s2951_s16 = scalar_lea.vmem %s2531_s5, 512 }
  0x39   : > { %2611 = vmatmul.mubr.msk.f32.vlgmr.msra.gmra.mxu0 %vm206_vm1, %v170_v8  ;;  %2615 = vmatmul.mubr.msk.f32.vlgmr.msra.gmra.mxu1 %vm206_vm1, %v170_v8  ;;  %v177_v23 = vld [vmem:[%s3634_s0 + $0x38] sm:$0xff]  ;;  %v176_v24 = vld [vmem:[%s3634_s0 + $0x30] sm:$0xff]  ;;  %p2952_p11 = scmp.ne.s32.totalorder %s2531_s5, %s2951_s16  ;;  %p3647_p12 = scmp.ne.s32.totalorder %s3641_s21, 0 }
  0x3a   : > { %316 = vmatprep.mubr.f32.mxu0 %v3018_v0  ;;  %393 = vmatprep.mubr.f32.mxu1 %v3018_v0  ;;  %s3021_s17 = smov [#allocation5]  }
  0x3b   : > { %2617 = vmatprep.subr.msk.mxu0 %vm213_vm0, %v200_v9  ;;  %2621 = vmatprep.subr.msk.mxu1 %vm213_vm0, %v201_v10  ;;  %p2953_p13 = pnand %p2952_p11, %p3647_p12  ;;  %s2955_s19 = sshll.u32 %s3021_s17, 4  ;;  %s2956_s19 = int_to_ptr.vmem [resolvable:$false] %s2955_s19 }
  0x3c   : > { %2618 = vmatpush1.msk.msra.mxu0 %vm213_vm0, %v164_v6  ;;  %2622 = vmatpush1.msk.msra.mxu1 %vm213_vm0, %v165_v7  ;;  %s2957_s13 = scalar_lea.vmem %s2956_s19, 1024  ;;  %p2958_p3 = scmp.lt.s32.totalorder %s2531_s5, %s2956_s19 }
  0x3d   : > { %2612 = vmatmul.mubr.msk.f32.gmra.mxu0 %vm206_vm1, %v171_v13  ;;  %2616 = vmatmul.mubr.msk.f32.gmra.mxu1 %vm206_vm1, %v171_v13  ;;  %p2954_p1 = pneg %p2953_p13  ;;  %p2959_p5 = scmp.lt.s32.totalorder %s2957_s13, %s2951_s16 }
  0x3e   : > { %464 = vmatprep.mubr.f32.mxu0 %v3018_v0  ;;  %541 = vmatprep.mubr.f32.mxu1 %v3018_v0 }
  0x3f   : > { %2625 = vmatprep.subr.msk.mxu0 %vm213_vm0, %v202_v14  ;;  %2629 = vmatprep.subr.msk.mxu1 %vm213_vm0, %v203_v15  ;;  %p2960_p8 = por %p2959_p5, %p2958_p3 }
  0x40   : > { %187 = vperm.xlu0 %2721, %v173_v18   ;;  %901 = vperm.xlu1 %2722, %v177_v23   ;;  %v3253_v18 = vld [vmem:[%s3634_s0 + $0x20] sm:$0xff] }
  0x41   : > { %2619 = vmatmul.mubr.msk.f32.vlgmr.msra.gmra.mxu0 %vm206_vm1, %v170_v8  ;;  %2623 = vmatmul.mubr.msk.f32.vlgmr.msra.gmra.mxu1 %vm206_vm1, %v170_v8  ;;  %p2961_p10 = pnand %p2960_p8, %p2954_p1 }
  0x42   : > { %470 = vmatprep.mubr.f32.mxu0 %v3018_v0  ;;  %547 = vmatprep.mubr.f32.mxu1 %v3018_v0 }
  0x43   : > { %2626 = vmatpush1.msk.msra.mxu0 %vm213_vm0, %v166_v11  ;;  %2630 = vmatpush1.msk.msra.mxu1 %vm213_vm0, %v167_v12 }
  0x44   : > { %2633 = vmatprep.subr.msk.mxu0 %vm213_vm0, %v204_v19  ;;  %2637 = vmatprep.subr.msk.mxu1 %vm213_vm0, %v205_v20 }
  0x45   : > { %2620 = vmatmul.mubr.msk.f32.gmra.mxu0 %vm206_vm1, %v171_v13  ;;  %2624 = vmatmul.mubr.msk.f32.gmra.mxu1 %vm206_vm1, %v171_v13 }
  0x46   : > { %618 = vmatprep.mubr.f32.mxu0 %v3018_v0  ;;  %695 = vmatprep.mubr.f32.mxu1 %v3018_v0 }
  0x47   : > { %182 = vperm.xlu0 %2721, %v172_v21   ;;  %896 = vperm.xlu1 %2722, %v176_v24  }
  0x49   : > { %2627 = vmatmul.mubr.msk.f32.vlgmr.msra.gmra.mxu0 %vm206_vm1, %v170_v8  ;;  %2631 = vmatmul.mubr.msk.f32.vlgmr.msra.gmra.mxu1 %vm206_vm1, %v170_v8 }
  0x4a   : > { %624 = vmatprep.mubr.f32.mxu0 %v3018_v0  ;;  %701 = vmatprep.mubr.f32.mxu1 %v3018_v0 }
  0x4b   : > { %2634 = vmatpush1.msk.msra.mxu0 %vm213_vm0, %v168_v16  ;;  %2638 = vmatpush1.msk.msra.mxu1 %vm213_vm0, %v169_v17 }
  0x4c   : > { %1561 = vperm.xlu0 %2721, %v179_v22  }
  0x4d   : > { %2628 = vmatmul.mubr.msk.f32.gmra.mxu0 %vm206_vm1, %v171_v13  ;;  %2632 = vmatmul.mubr.msk.f32.gmra.mxu1 %vm206_vm1, %v171_v13 }
  0x4e   : > { %772 = vmatprep.mubr.f32.mxu0 %v3018_v0  ;;  %849 = vmatprep.mubr.f32.mxu1 %v3018_v0 }
  0x51   : > { %2635 = vmatmul.mubr.msk.f32.vlgmr.msra.gmra.mxu0 %vm206_vm1, %v170_v8  ;;  %2639 = vmatmul.mubr.msk.f32.vlgmr.msra.gmra.mxu1 %vm206_vm1, %v170_v8 }
  0x52   : > { %778 = vmatprep.mubr.f32.mxu0 %v3018_v0  ;;  %855 = vmatprep.mubr.f32.mxu1 %v3018_v0 }
  0x55   : > { %2636 = vmatmul.mubr.msk.f32.gmra.mxu0 %vm206_vm1, %v171_v13  ;;  %2640 = vmatmul.mubr.msk.f32.gmra.mxu1 %vm206_vm1, %v171_v13 }
  0x56   : > { %975 = vmatprep.mubr.f32.mxu0 %v3018_v0  ;;  %1052 = vmatprep.mubr.f32.mxu1 %v3018_v0 }
  0xbb   : > { %v3224_v25 = vpop.permute.xlu0 %187 }
  0xc2   : > { %v3226_v26 = vpop.permute.xlu0 %182 }
  0xf9   : > { %v312_v27 = vpop.f32.mrf.mxu0  ;;  %v389_v28 = vpop.f32.mrf.mxu1 }
  0xfa   : > { %v313_v29 = vadd.f32 %v312_v27, %v3226_v26  ;;  %v390_v44 = vadd.f32 %v389_v28, %v3226_v26 }
  0xfb   : > { %v314_v30 = vpop.f32.mrf.mxu0  ;;  %v391_v31 = vpop.f32.mrf.mxu1 }
  0xfc   : > { %v315_v32 = vadd.f32 %v314_v30, %v3226_v26  ;;  %2731 = vtanh.f32 %v313_v29  ;;  %v392_v41 = vadd.f32 %v391_v31, %v3226_v26  ;;  %v3266_v31 = vld [vmem:[%s3634_s0 + $0x28] sm:$0xff] }
  0xfd   : > { %v318_v33 = vpop.f32.mrf.mxu0  ;;  %v395_v34 = vpop.f32.mrf.mxu1 }
  0xfe   : > { %v319_v35 = vadd.f32 %v318_v33, %v3224_v25  ;;  %2733 = vtanh.f32 %v315_v32  ;;  %v396_v38 = vadd.f32 %v395_v34, %v3224_v25 }
  0xff   : > { %v320_v36 = vpop.f32.mrf.mxu0  ;;  %v397_v37 = vpop.f32.mrf.mxu1 }
 0x100   : > { %v321_v39 = vadd.f32 %v320_v36, %v3224_v25  ;;  %v398_v40 = vadd.f32 %v397_v37, %v3224_v25  ;;  %2735 = vtanh.f32 %v319_v35 }
 0x101   : > { %v466_v42 = vpop.f32.mrf.mxu0  ;;  %v543_v43 = vpop.f32.mrf.mxu1 }
 0x102   : > { %2737 = vtanh.f32 %v321_v39  ;;  %v467_v59 = vadd.f32 %v466_v42, %v3226_v26  ;;  %v544_v60 = vadd.f32 %v543_v43, %v3226_v26 }
 0x103   : > { %2739 = vtanh.f32 %v398_v40  ;;  %v468_v45 = vpop.f32.mrf.mxu0  ;;  %v545_v46 = vpop.f32.mrf.mxu1 }
 0x104   : > { %2741 = vtanh.f32 %v396_v38  ;;  %v469_v47 = vadd.f32 %v468_v45, %v3226_v26  ;;  %v546_v56 = vadd.f32 %v545_v46, %v3226_v26 }
 0x105   : > { %2743 = vtanh.f32 %v392_v41  ;;  %v472_v48 = vpop.f32.mrf.mxu0  ;;  %v549_v49 = vpop.f32.mrf.mxu1 }
 0x106   : > { %2745 = vtanh.f32 %v390_v44  ;;  %v473_v50 = vadd.f32 %v472_v48, %v3224_v25  ;;  %v550_v53 = vadd.f32 %v549_v49, %v3224_v25 }
 0x107   : > { %v474_v51 = vpop.f32.mrf.mxu0  ;;  %v551_v52 = vpop.f32.mrf.mxu1  ;;  %2747 = vtanh.f32 %v469_v47 }
 0x108   : > { %v475_v54 = vadd.f32 %v474_v51, %v3224_v25  ;;  %v552_v55 = vadd.f32 %v551_v52, %v3224_v25  ;;  %2749 = vtanh.f32 %v473_v50 }
 0x109   : > { %v620_v57 = vpop.f32.mrf.mxu0  ;;  %v697_v58 = vpop.f32.mrf.mxu1 }
 0x10a   : > { %2751 = vtanh.f32 %v475_v54  ;;  %v2732_v63 = vpop.eup %2731  ;;  %v621_v1 = vadd.f32 %v620_v57, %v3226_v26  ;;  %v698_v22 = vadd.f32 %v697_v58, %v3226_v26 }
 0x10b   : > { %2753 = vtanh.f32 %v552_v55  ;;  %v622_v61 = vpop.f32.mrf.mxu0  ;;  %v699_v62 = vpop.f32.mrf.mxu1 }
 0x10c   : > { %2755 = vtanh.f32 %v550_v53  ;;  %v2734_v2 = vpop.eup %2733  ;;  %v623_v11 = vadd.f32 %v622_v61, %v3226_v26  ;;  %v700_v20 = vadd.f32 %v699_v62, %v3226_v26  ;;  %v3318_v62 = vpop.permute.xlu1 %901 }
 0x10d   : > { %2757 = vtanh.f32 %v546_v56  ;;  %v626_v3 = vpop.f32.mrf.mxu0  ;;  %v703_v4 = vpop.f32.mrf.mxu1 }
 0x10e   : > { %v2736_v5 = vpop.eup %2735  ;;  %2759 = vtanh.f32 %v467_v59  ;;  %v627_v6 = vadd.f32 %v626_v3, %v3224_v25  ;;  %v704_v15 = vadd.f32 %v703_v4, %v3224_v25 }
 0x10f   : > { %v2738_v7 = vpop.eup %2737  ;;  %2761 = vtanh.f32 %v544_v60  ;;  %v628_v8 = vpop.f32.mrf.mxu0 }
 0x110   : > { %v705_v9 = vpop.f32.mrf.mxu1  ;;  %v2740_v10 = vpop.eup %2739  ;;  %2763 = vtanh.f32 %v621_v1  ;;  %v629_v12 = vadd.f32 %v628_v8, %v3224_v25  ;;  %939 = vmatprep.subr.mxu0 %v2738_v7 }
 0x111   : > { %v706_v13 = vadd.f32 %v705_v9, %v3224_v25  ;;  %v2742_v14 = vpop.eup %2741  ;;  %2765 = vtanh.f32 %v627_v6  ;;  %1016 = vmatprep.subr.mxu1 %v2740_v10  ;;  %v774_v16 = vpop.f32.mrf.mxu0  ;;  %940 = vmatpush1.msra.mxu0 %v2736_v5 }
 0x112   : > { %v851_v17 = vpop.f32.mrf.mxu1  ;;  %v2744_v19 = vpop.eup %2743  ;;  %2767 = vtanh.f32 %v629_v12  ;;  %1017 = vmatpush1.msra.mxu1 %v2742_v14  ;;  %941 = vmatprep.subr.mxu0 %v2734_v2  ;;  %v775_v27 = vadd.f32 %v774_v16, %v3226_v26 }
 0x113   : > { %v2746_v21 = vpop.eup %2745  ;;  %2769 = vtanh.f32 %v706_v13  ;;  %1018 = vmatprep.subr.mxu1 %v2744_v19  ;;  %v776_v23 = vpop.f32.mrf.mxu0  ;;  %942 = vmatpush1.msra.mxu0 %v2732_v63 }
 0x114   : > { %v853_v24 = vpop.f32.mrf.mxu1  ;;  %2771 = vtanh.f32 %v623_v11  ;;  %1019 = vmatpush1.msra.mxu1 %v2746_v21  ;;  %2641 = vmatmul.mubr.msk.f32.vlgmr.msra.gmra.mxu0 %vm904_vm2, %v3253_v18  ;;  %v2748_v28 = vpop.eup %2747  ;;  %v777_v42 = vadd.f32 %v776_v23, %v3226_v26 }
 0x115   : > { %2773 = vtanh.f32 %v704_v15  ;;  %2643 = vmatmul.mubr.msk.f32.vlgmr.msra.gmra.mxu1 %vm904_vm2, %v3253_v18  ;;  %v780_v29 = vpop.f32.mrf.mxu0  ;;  %981 = vmatprep.mubr.f32.mxu0 %v3018_v0  ;;  %v2750_v32 = vpop.eup %2749  ;;  %v854_v44 = vadd.f32 %v853_v24, %v3226_v26 }
 0x116   : > { %v857_v30 = vpop.f32.mrf.mxu1  ;;  %2775 = vtanh.f32 %v700_v20  ;;  %v781_v33 = vadd.f32 %v780_v29, %v3224_v25  ;;  %1058 = vmatprep.mubr.f32.mxu1 %v3018_v0  ;;  %v3320_v63 = vpop.permute.xlu1 %896 }
 0x117   : > { %v2752_v34 = vpop.eup %2751  ;;  %2777 = vtanh.f32 %v698_v22  ;;  %v782_v35 = vpop.f32.mrf.mxu0  ;;  %v858_v38 = vadd.f32 %v857_v30, %v3224_v25 }
 0x118   : > { %v859_v36 = vpop.f32.mrf.mxu1  ;;  %v2754_v37 = vpop.eup %2753  ;;  %2779 = vtanh.f32 %v775_v27  ;;  %v783_v39 = vadd.f32 %v782_v35, %v3224_v25  ;;  %2642 = vmatmul.mubr.msk.f32.gmra.mxu0 %vm904_vm2, %v3266_v31  ;;  %1093 = vmatprep.subr.mxu0 %v2752_v34 }
 0x119   : > { %v860_v40 = vadd.f32 %v859_v36, %v3224_v25  ;;  %v2756_v41 = vpop.eup %2755  ;;  %2781 = vtanh.f32 %v781_v33  ;;  %2644 = vmatmul.mubr.msk.f32.gmra.mxu1 %vm904_vm2, %v3266_v31  ;;  %1170 = vmatprep.subr.mxu1 %v2754_v37  ;;  %v852_v25 = vadd.f32 %v851_v17, %v3226_v26 }
 0x11a   : > { %v2758_v43 = vpop.eup %2757  ;;  %2783 = vtanh.f32 %v783_v39  ;;  %1094 = vmatpush1.msra.mxu0 %v2750_v32  ;;  %1171 = vmatpush1.msra.mxu1 %v2756_v41 }
 0x11b   : > { %v2760_v45 = vpop.eup %2759  ;;  %2785 = vtanh.f32 %v860_v40  ;;  %1095 = vmatprep.subr.mxu0 %v2748_v28  ;;  %1172 = vmatprep.subr.mxu1 %v2758_v43 }
 0x11c   : > { %v2762_v46 = vpop.eup %2761  ;;  %2787 = vtanh.f32 %v858_v38  ;;  %1096 = vmatpush1.msra.mxu0 %v2760_v45  ;;  %1129 = vmatprep.mubr.f32.mxu0 %v3018_v0 }
 0x11d   : > { %v2764_v47 = vpop.eup %2763  ;;  %2789 = vtanh.f32 %v777_v42  ;;  %1173 = vmatpush1.msra.mxu1 %v2762_v46  ;;  %1206 = vmatprep.mubr.f32.mxu1 %v3018_v0 }
 0x11e   : > { %v2766_v48 = vpop.eup %2765  ;;  %2791 = vtanh.f32 %v854_v44  ;;  %2645 = vmatmul.mubr.msk.f32.vlgmr.msra.gmra.mxu0 %vm904_vm2, %v3253_v18  ;;  %2647 = vmatmul.mubr.msk.f32.vlgmr.msra.gmra.mxu1 %vm904_vm2, %v3253_v18 }
 0x11f   : > { %v2768_v26 = vpop.eup %2767  ;;  %2793 = vtanh.f32 %v852_v25  ;;  %1135 = vmatprep.mubr.f32.mxu0 %v3018_v0  ;;  %1212 = vmatprep.mubr.f32.mxu1 %v3018_v0 }
 0x120   : > { %v2770_v49 = vpop.eup %2769  ;;  %1247 = vmatprep.subr.mxu0 %v2768_v26 }
 0x121   : > { %v2772_v50 = vpop.eup %2771  ;;  %1324 = vmatprep.subr.mxu1 %v2770_v49  ;;  %1248 = vmatpush1.msra.mxu0 %v2766_v48  ;;  %v3344_v49 = vld [vmem:[%s3634_s0 + $0x40] sm:$0xff] }
 0x122   : > { %v2774_v51 = vpop.eup %2773  ;;  %2646 = vmatmul.mubr.msk.f32.gmra.mxu0 %vm904_vm2, %v3266_v31  ;;  %2648 = vmatmul.mubr.msk.f32.gmra.mxu1 %vm904_vm2, %v3266_v31 }
 0x123   : > { %v2776_v52 = vpop.eup %2775  ;;  %1325 = vmatpush1.msra.mxu1 %v2774_v51  ;;  %1249 = vmatprep.subr.mxu0 %v2772_v50 }
 0x124   : > { %v2778_v53 = vpop.eup %2777  ;;  %1326 = vmatprep.subr.mxu1 %v2776_v52  ;;  %1250 = vmatpush1.msra.mxu0 %v2764_v47 }
 0x125   : > { %v2780_v54 = vpop.eup %2779  ;;  %1283 = vmatprep.mubr.f32.mxu0 %v3018_v0  ;;  %1327 = vmatpush1.msra.mxu1 %v2778_v53 }
 0x126   : > { %v2782_v55 = vpop.eup %2781  ;;  %1360 = vmatprep.mubr.f32.mxu1 %v3018_v0  ;;  %2649 = vmatmul.mubr.msk.f32.vlgmr.msra.gmra.mxu0 %vm904_vm2, %v3253_v18 }
 0x127   : > { %v2784_v56 = vpop.eup %2783  ;;  %2651 = vmatmul.mubr.msk.f32.vlgmr.msra.gmra.mxu1 %vm904_vm2, %v3253_v18  ;;  %1289 = vmatprep.mubr.f32.mxu0 %v3018_v0 }
 0x128   : > { %v2786_v57 = vpop.eup %2785  ;;  %1366 = vmatprep.mubr.f32.mxu1 %v3018_v0  ;;  %1401 = vmatprep.subr.mxu0 %v2784_v56 }
 0x129   : > { %v2788_v58 = vpop.eup %2787  ;;  %1478 = vmatprep.subr.mxu1 %v2786_v57  ;;  %1402 = vmatpush1.msra.mxu0 %v2782_v55 }
 0x12a   : > { %v2790_v59 = vpop.eup %2789  ;;  %2650 = vmatmul.mubr.msk.f32.gmra.mxu0 %vm904_vm2, %v3266_v31  ;;  %1479 = vmatpush1.msra.mxu1 %v2788_v58 }
 0x12b   : > { %v2792_v60 = vpop.eup %2791  ;;  %2652 = vmatmul.mubr.msk.f32.gmra.mxu1 %vm904_vm2, %v3266_v31  ;;  %1403 = vmatprep.subr.mxu0 %v2790_v59 }
 0x12c   : > { %v2794_v61 = vpop.eup %2793  ;;  %1480 = vmatprep.subr.mxu1 %v2792_v60  ;;  %1404 = vmatpush1.msra.mxu0 %v2780_v54 }
 0x12d   : > { %1437 = vmatprep.mubr.f32.mxu0 %v3018_v0  ;;  %1481 = vmatpush1.msra.mxu1 %v2794_v61 }
 0x12e   : > { %1514 = vmatprep.mubr.f32.mxu1 %v3018_v0  ;;  %2653 = vmatmul.mubr.msk.f32.vlgmr.msra.gmra.mxu0 %vm904_vm2, %v3253_v18 }
 0x12f   : > { %2655 = vmatmul.mubr.msk.f32.vlgmr.msra.gmra.mxu1 %vm904_vm2, %v3253_v18  ;;  %1443 = vmatprep.mubr.f32.mxu0 %v3018_v0 }
 0x130   : > { %1520 = vmatprep.mubr.f32.mxu1 %v3018_v0 }
 0x132   : > { %2654 = vmatmul.mubr.msk.f32.gmra.mxu0 %vm904_vm2, %v3266_v31 }
 0x133   : > { %2656 = vmatmul.mubr.msk.f32.gmra.mxu1 %vm904_vm2, %v3266_v31  ;;  %1631 = vmatprep.mubr.f32.mxu0 %v3018_v0 }
 0x134   : > { %1702 = vmatprep.mubr.f32.mxu1 %v3018_v0 }
 0x1d4   : > { %v977_v1 = vpop.f32.mrf.mxu0 }
 0x1d5   : > { %v1054_v2 = vpop.f32.mrf.mxu1  ;;  %v978_v4 = vadd.f32 %v977_v1, %v3320_v63 }
 0x1d6   : > { %v979_v3 = vpop.f32.mrf.mxu0  ;;  %v1055_v16 = vadd.f32 %v1054_v2, %v3320_v63 }
 0x1d7   : > { %v1056_v5 = vpop.f32.mrf.mxu1  ;;  %v980_v6 = vadd.f32 %v979_v3, %v3320_v63  ;;  %2795 = vtanh.f32 %v978_v4 }
 0x1d8   : > { %v983_v7 = vpop.f32.mrf.mxu0  ;;  %v1057_v15 = vadd.f32 %v1056_v5, %v3320_v63 }
 0x1d9   : > { %v984_v8 = vadd.f32 %v983_v7, %v3318_v62  ;;  %v1060_v9 = vpop.f32.mrf.mxu1  ;;  %2797 = vtanh.f32 %v980_v6 }
 0x1da   : > { %v985_v10 = vpop.f32.mrf.mxu0  ;;  %v1061_v11 = vadd.f32 %v1060_v9, %v3318_v62 }
 0x1db   : > { %v986_v12 = vadd.f32 %v985_v10, %v3318_v62  ;;  %v1062_v13 = vpop.f32.mrf.mxu1  ;;  %2799 = vtanh.f32 %v984_v8 }
 0x1dc   : > { %v1063_v14 = vadd.f32 %v1062_v13, %v3318_v62 }
 0x1dd   : > { %2801 = vtanh.f32 %v986_v12 }
 0x1de   : > { %2803 = vtanh.f32 %v1063_v14  ;;  %v1131_v17 = vpop.f32.mrf.mxu0  ;;  %v1208_v18 = vpop.f32.mrf.mxu1 }
 0x1df   : > { %2805 = vtanh.f32 %v1061_v11  ;;  %v1132_v19 = vadd.f32 %v1131_v17, %v3320_v63  ;;  %v1209_v36 = vadd.f32 %v1208_v18, %v3320_v63 }
 0x1e0   : > { %v1133_v20 = vpop.f32.mrf.mxu0  ;;  %v1210_v21 = vpop.f32.mrf.mxu1  ;;  %2807 = vtanh.f32 %v1057_v15 }
 0x1e1   : > { %v1134_v22 = vadd.f32 %v1133_v20, %v3320_v63  ;;  %2809 = vtanh.f32 %v1055_v16  ;;  %v1211_v33 = vadd.f32 %v1210_v21, %v3320_v63 }
 0x1e2   : > { %v1137_v23 = vpop.f32.mrf.mxu0  ;;  %v1214_v24 = vpop.f32.mrf.mxu1  ;;  %2811 = vtanh.f32 %v1132_v19 }
 0x1e3   : > { %v1138_v27 = vadd.f32 %v1137_v23, %v3318_v62  ;;  %2813 = vtanh.f32 %v1134_v22  ;;  %v1215_v30 = vadd.f32 %v1214_v24, %v3318_v62 }
 0x1e4   : > { %v1139_v28 = vpop.f32.mrf.mxu0  ;;  %v1216_v29 = vpop.f32.mrf.mxu1 }
 0x1e5   : > { %v1140_v31 = vadd.f32 %v1139_v28, %v3318_v62  ;;  %v1217_v32 = vadd.f32 %v1216_v29, %v3318_v62  ;;  %2815 = vtanh.f32 %v1138_v27  ;;  %v2796_v35 = vpop.eup %2795 }
 0x1e6   : > { %v1285_v34 = vpop.f32.mrf.mxu0  ;;  %v2798_v38 = vpop.eup %2797 }
 0x1e7   : > { %2817 = vtanh.f32 %v1140_v31  ;;  %v1362_v37 = vpop.f32.mrf.mxu1  ;;  %v1286_v39 = vadd.f32 %v1285_v34, %v3320_v63 }
 0x1e8   : > { %2819 = vtanh.f32 %v1217_v32  ;;  %v1287_v40 = vpop.f32.mrf.mxu0  ;;  %v2800_v41 = vpop.eup %2799  ;;  %v1363_v58 = vadd.f32 %v1362_v37, %v3320_v63 }
 0x1e9   : > { %2821 = vtanh.f32 %v1215_v30  ;;  %v1288_v42 = vadd.f32 %v1287_v40, %v3320_v63  ;;  %v1364_v43 = vpop.f32.mrf.mxu1 }
 0x1ea   : > { %v2802_v44 = vpop.eup %2801  ;;  %2823 = vtanh.f32 %v1211_v33  ;;  %v1291_v45 = vpop.f32.mrf.mxu0  ;;  %v1365_v55 = vadd.f32 %v1364_v43, %v3320_v63 }
 0x1eb   : > { %v2804_v25 = vpop.eup %2803  ;;  %2825 = vtanh.f32 %v1209_v36  ;;  %v1292_v46 = vadd.f32 %v1291_v45, %v3318_v62  ;;  %v1368_v47 = vpop.f32.mrf.mxu1  ;;  %1595 = vmatprep.subr.mxu0 %v2802_v44 }
 0x1ec   : > { %v2806_v48 = vpop.eup %2805  ;;  %2827 = vtanh.f32 %v1286_v39  ;;  %v1293_v26 = vpop.f32.mrf.mxu0  ;;  %1666 = vmatprep.subr.mxu1 %v2804_v25  ;;  %1596 = vmatpush1.msra.mxu0 %v2800_v41  ;;  %v1369_v51 = vadd.f32 %v1368_v47, %v3318_v62 }
 0x1ed   : > { %v2808_v50 = vpop.eup %2807  ;;  %2829 = vtanh.f32 %v1288_v42  ;;  %v1294_v52 = vadd.f32 %v1293_v26, %v3318_v62  ;;  %v1370_v53 = vpop.f32.mrf.mxu1  ;;  %1667 = vmatpush1.msra.mxu1 %v2806_v48  ;;  %1597 = vmatprep.subr.mxu0 %v2798_v38 }
 0x1ee   : > { %v2810_v54 = vpop.eup %2809  ;;  %2831 = vtanh.f32 %v1292_v46  ;;  %v1371_v56 = vadd.f32 %v1370_v53, %v3318_v62  ;;  %v1439_v57 = vpop.f32.mrf.mxu0  ;;  %1668 = vmatprep.subr.mxu1 %v2808_v50  ;;  %1598 = vmatpush1.msra.mxu0 %v2796_v35 }
 0x1ef   : > { %2833 = vtanh.f32 %v1294_v52  ;;  %v1516_v59 = vpop.f32.mrf.mxu1  ;;  %1669 = vmatpush1.msra.mxu1 %v2810_v54  ;;  %2657 = vmatmul.mubr.msk.f32.vlgmr.msra.gmra.mxu0 %vm904_vm2, %v3344_v49  ;;  %v1440_v60 = vadd.f32 %v1439_v57, %v3320_v63  ;;  %v2812_v1 = vpop.eup %2811 }
 0x1f0   : > { %2835 = vtanh.f32 %v1371_v56  ;;  %v1441_v61 = vpop.f32.mrf.mxu0  ;;  %2658 = vmatmul.mubr.msk.f32.vlgmr.msra.gmra.mxu1 %vm904_vm2, %v3344_v49  ;;  %1773 = vmatprep.mubr.f32.mxu0 %v3018_v0  ;;  %v2814_v4 = vpop.eup %2813  ;;  %v1517_v19 = vadd.f32 %v1516_v59, %v3320_v63 }
 0x1f1   : > { %2837 = vtanh.f32 %v1369_v51  ;;  %v1442_v2 = vadd.f32 %v1441_v61, %v3320_v63  ;;  %v1518_v3 = vpop.f32.mrf.mxu1  ;;  %1844 = vmatprep.mubr.f32.mxu1 %v3018_v0 }
 0x1f2   : > { %2839 = vtanh.f32 %v1365_v55  ;;  %v1445_v5 = vpop.f32.mrf.mxu0  ;;  %v2816_v6 = vpop.eup %2815  ;;  %v1519_v16 = vadd.f32 %v1518_v3, %v3320_v63 }
 0x1f3   : > { %2841 = vtanh.f32 %v1363_v58  ;;  %v1446_v7 = vadd.f32 %v1445_v5, %v3318_v62  ;;  %v1522_v8 = vpop.f32.mrf.mxu1 }
 0x1f4   : > { %v2818_v9 = vpop.eup %2817  ;;  %2843 = vtanh.f32 %v1440_v60  ;;  %v1447_v10 = vpop.f32.mrf.mxu0  ;;  %v1523_v12 = vadd.f32 %v1522_v8, %v3318_v62 }
 0x1f5   : > { %v2820_v11 = vpop.eup %2819  ;;  %2845 = vtanh.f32 %v1442_v2  ;;  %v1448_v13 = vadd.f32 %v1447_v10, %v3318_v62  ;;  %v1524_v14 = vpop.f32.mrf.mxu1  ;;  %1737 = vmatprep.subr.mxu0 %v2818_v9 }
 0x1f6   : > { %v2822_v15 = vpop.eup %2821  ;;  %2847 = vtanh.f32 %v1446_v7  ;;  %v1525_v17 = vadd.f32 %v1524_v14, %v3318_v62  ;;  %1808 = vmatprep.subr.mxu1 %v2820_v11  ;;  %1738 = vmatpush1.msra.mxu0 %v2816_v6 }
 0x1f7   : > { %v2824_v18 = vpop.eup %2823  ;;  %2849 = vtanh.f32 %v1448_v13  ;;  %1809 = vmatpush1.msra.mxu1 %v2822_v15  ;;  %1739 = vmatprep.subr.mxu0 %v2814_v4 }
 0x1f8   : > { %v2826_v20 = vpop.eup %2825  ;;  %2851 = vtanh.f32 %v1525_v17  ;;  %1810 = vmatprep.subr.mxu1 %v2824_v18  ;;  %1740 = vmatpush1.msra.mxu0 %v2812_v1 }
 0x1f9   : > { %v2828_v21 = vpop.eup %2827  ;;  %2853 = vtanh.f32 %v1523_v12  ;;  %1811 = vmatpush1.msra.mxu1 %v2826_v20  ;;  %2659 = vmatmul.mubr.msk.f32.vlgmr.msra.gmra.mxu0 %vm904_vm2, %v3344_v49 }
 0x1fa   : > { %v2830_v22 = vpop.eup %2829  ;;  %2855 = vtanh.f32 %v1519_v16  ;;  %2660 = vmatmul.mubr.msk.f32.vlgmr.msra.gmra.mxu1 %vm904_vm2, %v3344_v49  ;;  %1915 = vmatprep.mubr.f32.mxu0 %v3018_v0 }
 0x1fb   : > { %v2832_v62 = vpop.eup %2831  ;;  %2857 = vtanh.f32 %v1517_v19  ;;  %1986 = vmatprep.mubr.f32.mxu1 %v3018_v0 }
 0x1fc   : > { %v2834_v63 = vpop.eup %2833 }
 0x1fd   : > { %v2836_v23 = vpop.eup %2835  ;;  %1879 = vmatprep.subr.mxu0 %v2834_v63 }
 0x1fe   : > { %v2838_v24 = vpop.eup %2837  ;;  %1950 = vmatprep.subr.mxu1 %v2836_v23  ;;  %1880 = vmatpush1.msra.mxu0 %v2832_v62 }
 0x1ff   : > { %v2840_v27 = vpop.eup %2839  ;;  %1951 = vmatpush1.msra.mxu1 %v2838_v24  ;;  %1881 = vmatprep.subr.mxu0 %v2830_v22 }
 0x200   : > { %v2842_v28 = vpop.eup %2841  ;;  %1952 = vmatprep.subr.mxu1 %v2840_v27  ;;  %1882 = vmatpush1.msra.mxu0 %v2828_v21 }
 0x201   : > { %v2844_v29 = vpop.eup %2843  ;;  %1953 = vmatpush1.msra.mxu1 %v2842_v28  ;;  %2661 = vmatmul.mubr.msk.f32.vlgmr.msra.gmra.mxu0 %vm904_vm2, %v3344_v49 }
 0x202   : > { %v2846_v30 = vpop.eup %2845  ;;  %2662 = vmatmul.mubr.msk.f32.vlgmr.msra.gmra.mxu1 %vm904_vm2, %v3344_v49  ;;  %2057 = vmatprep.mubr.f32.mxu0 %v3018_v0 }
 0x203   : > { %v2848_v31 = vpop.eup %2847  ;;  %2128 = vmatprep.mubr.f32.mxu1 %v3018_v0  ;;  %v3381_v0 = vpop.permute.xlu0 %1561 }
 0x204   : > { %v2850_v32 = vpop.eup %2849 }
 0x205   : > { %v2852_v33 = vpop.eup %2851  ;;  %2021 = vmatprep.subr.mxu0 %v2850_v32 }
 0x206   : > { %v2854_v34 = vpop.eup %2853  ;;  %2092 = vmatprep.subr.mxu1 %v2852_v33  ;;  %2022 = vmatpush1.msra.mxu0 %v2848_v31 }
 0x207   : > { %v2856_v35 = vpop.eup %2855  ;;  %2093 = vmatpush1.msra.mxu1 %v2854_v34  ;;  %2023 = vmatprep.subr.mxu0 %v2846_v30 }
 0x208   : > { %v2858_v36 = vpop.eup %2857  ;;  %2094 = vmatprep.subr.mxu1 %v2856_v35  ;;  %2024 = vmatpush1.msra.mxu0 %v2844_v29 }
 0x209   : > { %2095 = vmatpush1.msra.mxu1 %v2858_v36  ;;  %2663 = vmatmul.mubr.msk.f32.vlgmr.msra.gmra.mxu0 %vm904_vm2, %v3344_v49 }
 0x20a   : > { %2664 = vmatmul.mubr.msk.f32.vlgmr.msra.gmra.mxu1 %vm904_vm2, %v3344_v49 }
 0x2af   : > { %v1633_v37 = vpop.f32.mrf.mxu0 }
 0x2b0   : > { %v3384_v38 = vadd.f32 %v1633_v37, %v3381_v0  ;;  %v1704_v39 = vpop.f32.mrf.mxu1 }
 0x2b1   : > { %v3387_v40 = vadd.f32 %v1704_v39, %v3381_v0  ;;  %v1635_v41 = vpop.f32.mrf.mxu0 }
 0x2b2   : > { %v2151_v42 = vrot.slane %v3384_v38, 1  ;;  %v3391_v43 = vadd.f32 %v1635_v41, %v3381_v0  ;;  %v1706_v44 = vpop.f32.mrf.mxu1 }
 0x2b3   : > { %v2153_v45 = vrot.slane %v3387_v40, 1  ;;  %v3395_v25 = vadd.f32 %v1706_v44, %v3381_v0 }
 0x2b4   : > { %v2199_v46 = vsub.f32 %v3384_v38, %v2151_v42  ;;  %v2152_v47 = vrot.slane %v3391_v43, 1 }
 0x2b5   : > { %v2201_v48 = vsub.f32 %v3387_v40, %v2153_v45  ;;  %v2154_v26 = vrot.slane %v3395_v25, 1 }
 0x2b6   : > { %v2215_v49 = vand.u32 2147483647, %v2199_v46  ;;  %v2200_v50 = vsub.f32 %v3391_v43, %v2152_v47 }
 0x2b7   : > { %v2217_v51 = vand.u32 2147483647, %v2201_v48  ;;  %v2202_v52 = vsub.f32 %v3395_v25, %v2154_v26 }
 0x2b8   : > { %v2231_v53 = vsub.f32 0.0, %v2215_v49  ;;  %v2216_v54 = vand.u32 2147483647, %v2200_v50 }
 0x2b9   : > { %v2233_v55 = vsub.f32 0.0, %v2217_v51  ;;  %v2218_v56 = vand.u32 2147483647, %v2202_v52  ;;  %v1775_v57 = vpop.f32.mrf.mxu0 }
 0x2ba   : > { %v2247_v58 = vmul.f32 1.442695, %v2231_v53  ;;  %v2232_v59 = vsub.f32 0.0, %v2216_v54  ;;  %v3412_v60 = vadd.f32 %v1775_v57, %v3381_v0  ;;  %v1846_v61 = vpop.f32.mrf.mxu1 }
 0x2bb   : > { %v2251_v1 = vmul.f32 1.442695, %v2233_v55  ;;  %v2234_v2 = vsub.f32 0.0, %v2218_v56  ;;  %v3415_v3 = vadd.f32 %v1846_v61, %v3381_v0  ;;  %v1777_v4 = vpop.f32.mrf.mxu0  ;;  %v2343_v61 = vlaneseq }
 0x2bc   : > { %2859 = vpow2.f32 %v2247_v58  ;;  %v2249_v5 = vmul.f32 1.442695, %v2232_v59  ;;  %v2155_v6 = vrot.slane %v3412_v60, 1  ;;  %v3419_v7 = vadd.f32 %v1777_v4, %v3381_v0  ;;  %v1848_v8 = vpop.f32.mrf.mxu1 }
 0x2bd   : > { %2861 = vpow2.f32 %v2251_v1  ;;  %v2253_v9 = vmul.f32 1.442695, %v2234_v2  ;;  %v2157_v10 = vrot.slane %v3415_v3, 1  ;;  %v3423_v11 = vadd.f32 %v1848_v8, %v3381_v0 }
 0x2be   : > { %2863 = vpow2.f32 %v2249_v5  ;;  %v2203_v12 = vsub.f32 %v3412_v60, %v2155_v6  ;;  %v2156_v13 = vrot.slane %v3419_v7, 1 }
 0x2bf   : > { %2865 = vpow2.f32 %v2253_v9  ;;  %v2205_v14 = vsub.f32 %v3415_v3, %v2157_v10  ;;  %v2158_v15 = vrot.slane %v3423_v11, 1 }
 0x2c0   : > { %v2219_v16 = vand.u32 2147483647, %v2203_v12  ;;  %v2204_v17 = vsub.f32 %v3419_v7, %v2156_v13 }
 0x2c1   : > { %v2221_v18 = vand.u32 2147483647, %v2205_v14  ;;  %v2206_v19 = vsub.f32 %v3423_v11, %v2158_v15  ;;  %v1917_v20 = vpop.f32.mrf.mxu0 }
 0x2c2   : > { %v2235_v21 = vsub.f32 0.0, %v2219_v16  ;;  %v2220_v22 = vand.u32 2147483647, %v2204_v17  ;;  %v3440_v62 = vadd.f32 %v1917_v20, %v3381_v0  ;;  %v1988_v63 = vpop.f32.mrf.mxu1 }
 0x2c3   : > { %v2237_v23 = vsub.f32 0.0, %v2221_v18  ;;  %v2222_v24 = vand.u32 2147483647, %v2206_v19  ;;  %v3443_v27 = vadd.f32 %v1988_v63, %v3381_v0  ;;  %v1919_v28 = vpop.f32.mrf.mxu0 }
 0x2c4   : > { %v2255_v29 = vmul.f32 1.442695, %v2235_v21  ;;  %v2236_v30 = vsub.f32 0.0, %v2220_v22  ;;  %v2159_v31 = vrot.slane %v3440_v62, 1  ;;  %v3447_v32 = vadd.f32 %v1919_v28, %v3381_v0  ;;  %v1990_v33 = vpop.f32.mrf.mxu1 }
 0x2c5   : > { %v2259_v34 = vmul.f32 1.442695, %v2237_v23  ;;  %v2238_v35 = vsub.f32 0.0, %v2222_v24  ;;  %v2161_v36 = vrot.slane %v3443_v27, 1  ;;  %v3451_v37 = vadd.f32 %v1990_v33, %v3381_v0 }
 0x2c6   : > { %2867 = vpow2.f32 %v2255_v29  ;;  %v2257_v39 = vmul.f32 1.442695, %v2236_v30  ;;  %v2207_v41 = vsub.f32 %v3440_v62, %v2159_v31  ;;  %v2160_v49 = vrot.slane %v3447_v32, 1 }
 0x2c7   : > { %2869 = vpow2.f32 %v2259_v34  ;;  %v2261_v44 = vmul.f32 1.442695, %v2238_v35  ;;  %v2209_v46 = vsub.f32 %v3443_v27, %v2161_v36  ;;  %v2162_v50 = vrot.slane %v3451_v37, 1 }
 0x2c8   : > { %2871 = vpow2.f32 %v2257_v39  ;;  %v2223_v48 = vand.u32 2147483647, %v2207_v41  ;;  %v2208_v57 = vsub.f32 %v3447_v32, %v2160_v49 }
 0x2c9   : > { %v2860_v51 = vpop.eup %2859  ;;  %2873 = vpow2.f32 %v2261_v44  ;;  %v2225_v52 = vand.u32 2147483647, %v2209_v46  ;;  %v2059_v53 = vpop.f32.mrf.mxu0  ;;  %v2210_v4 = vsub.f32 %v3451_v37, %v2162_v50 }
 0x2ca   : > { %v2862_v54 = vpop.eup %2861  ;;  %v2279_v55 = vadd.f32 1.0, %v2860_v51  ;;  %v2239_v56 = vsub.f32 0.0, %v2223_v48  ;;  %v2130_v58 = vpop.f32.mrf.mxu1  ;;  %v2224_v12 = vand.u32 2147483647, %v2208_v57  ;;  %v3468_v21 = vadd.f32 %v2059_v53, %v3381_v0 }
 0x2cb   : > { %v2864_v59 = vpop.eup %2863  ;;  %v2281_v1 = vadd.f32 1.0, %v2862_v54  ;;  %v2241_v2 = vsub.f32 0.0, %v2225_v52  ;;  %v2061_v14 = vpop.f32.mrf.mxu0  ;;  %v2226_v19 = vand.u32 2147483647, %v2210_v4  ;;  %v3471_v22 = vadd.f32 %v2130_v58, %v3381_v0 }
 0x2cc   : > { %v2866_v5 = vpop.eup %2865  ;;  %2875 = vlog2.f32 %v2279_v55  ;;  %v2280_v8 = vadd.f32 1.0, %v2864_v59  ;;  %v2263_v9 = vmul.f32 1.442695, %v2239_v56  ;;  %v2132_v16 = vpop.f32.mrf.mxu1  ;;  %v2240_v20 = vsub.f32 0.0, %v2224_v12 }
 0x2cd   : > { %2877 = vlog2.f32 %v2281_v1  ;;  %v2282_v17 = vadd.f32 1.0, %v2866_v5  ;;  %v2267_v18 = vmul.f32 1.442695, %v2241_v2  ;;  %v2242_v63 = vsub.f32 0.0, %v2226_v19 }
 0x2ce   : > { %2879 = vlog2.f32 %v2280_v8  ;;  %v3474_v23 = vadd.f32 %v2061_v14, %v3381_v0  ;;  %v3477_v24 = vadd.f32 %v2132_v16, %v3381_v0  ;;  %v2265_v28 = vmul.f32 1.442695, %v2240_v20 }
 0x2cf   : > { %2881 = vlog2.f32 %v2282_v17  ;;  %v2163_v29 = vrot.slane %v3468_v21, 1  ;;  %v2165_v30 = vrot.slane %v3471_v22, 1  ;;  %v2269_v33 = vmul.f32 1.442695, %v2242_v63 }
 0x2d0   : > { %2883 = vpow2.f32 %v2263_v9  ;;  %v2164_v34 = vrot.slane %v3474_v23, 1  ;;  %v2166_v35 = vrot.slane %v3477_v24, 1  ;;  %v3486_v0 = vshrl.u32 %v2343_v61, 7 }
 0x2d1   : > { %2885 = vpow2.f32 %v2267_v18  ;;  %v2211_v39 = vsub.f32 %v3468_v21, %v2163_v29  ;;  %v2213_v44 = vsub.f32 %v3471_v22, %v2165_v30  ;;  %v3020_v16 = vmov 1983009808  }
 0x2d2   : > { %2887 = vpow2.f32 %v2265_v28  ;;  %v2212_v46 = vsub.f32 %v3474_v23, %v2164_v34  ;;  %v2214_v53 = vsub.f32 %v3477_v24, %v2166_v35  ;;  %v3498_v8 = vsub.s32 0, %v3486_v0 }
 0x2d3   : > { %v2868_v41 = vpop.eup %2867  ;;  %2889 = vpow2.f32 %v2269_v33  ;;  %v2227_v52 = vand.u32 2147483647, %v2211_v39  ;;  %v2229_v56 = vand.u32 2147483647, %v2213_v44  ;;  %v2442_v17 = vunpack.c.l.s4 %v3020_v16 }
 0x2d4   : > { %v2870_v48 = vpop.eup %2869  ;;  %v2283_v51 = vadd.f32 1.0, %v2868_v41  ;;  %v2228_v57 = vand.u32 2147483647, %v2212_v46  ;;  %v2230_v1 = vand.u32 2147483647, %v2214_v53  ;;  %v2183_v63 = vmax.f32 %v3384_v38, %v2151_v42 }
 0x2d5   : > { %v2872_v54 = vpop.eup %2871  ;;  %v2285_v55 = vadd.f32 1.0, %v2870_v48  ;;  %v2243_v61 = vsub.f32 0.0, %v2227_v52  ;;  %v2245_v4 = vsub.f32 0.0, %v2229_v56  ;;  %v2185_v41 = vmax.f32 %v3387_v40, %v2153_v45 }
 0x2d6   : > { %v2874_v58 = vpop.eup %2873  ;;  %2891 = vlog2.f32 %v2283_v51  ;;  %v2284_v59 = vadd.f32 1.0, %v2872_v54  ;;  %v2244_v5 = vsub.f32 0.0, %v2228_v57  ;;  %v2246_v12 = vsub.f32 0.0, %v2230_v1 }
 0x2d7   : > { %2893 = vlog2.f32 %v2285_v55  ;;  %v2286_v2 = vadd.f32 1.0, %v2874_v58  ;;  %v2271_v9 = vmul.f32 1.442695, %v2243_v61  ;;  %v2275_v18 = vmul.f32 1.442695, %v2245_v4 }
 0x2d8   : > { %2895 = vlog2.f32 %v2284_v59  ;;  %v2273_v19 = vmul.f32 1.442695, %v2244_v5  ;;  %v2277_v33 = vmul.f32 1.442695, %v2246_v12  ;;  %v2184_v51 = vmax.f32 %v3391_v43, %v2152_v47 }
 0x2d9   : > { %v2876_v14 = vpop.eup %2875  ;;  %2897 = vlog2.f32 %v2286_v2  ;;  %v2186_v54 = vmax.f32 %v3395_v25, %v2154_v26  ;;  %v2443_v58 = vunpack.c.0.s8 %v2442_v17 }
 0x2da   : > { %v2878_v20 = vpop.eup %2877  ;;  %v2296_v28 = vmul.f32 0.6931472, %v2876_v14  ;;  %2899 = vpow2.f32 %v2271_v9 }
 0x2db   : > { %v2880_v39 = vpop.eup %2879  ;;  %v2300_v44 = vmul.f32 0.6931472, %v2878_v20  ;;  %2901 = vpow2.f32 %v2275_v18  ;;  %v3519_v17 = vsub.s32 %v2443_v58, %v3486_v0 }
 0x2dc   : > { %v2882_v46 = vpop.eup %2881  ;;  %v2327_v48 = vadd.f32 %v2296_v28, %v2183_v63  ;;  %v2298_v52 = vmul.f32 0.6931472, %v2880_v39  ;;  %2903 = vpow2.f32 %v2273_v19 }
 0x2dd   : > { %v2884_v53 = vpop.eup %2883  ;;  %v2329_v42 = vadd.f32 %v2300_v44, %v2185_v41  ;;  %v2302_v55 = vmul.f32 0.6931472, %v2882_v46  ;;  %2905 = vpow2.f32 %v2277_v33  ;;  %v2187_v33 = vmax.f32 %v3412_v60, %v2155_v6 }
 0x2de   : > { %v2886_v56 = vpop.eup %2885  ;;  %v2346_v45 = vrot.slane %v2327_v48, %v3498_v8  ;;  %v2328_v57 = vadd.f32 %v2298_v52, %v2184_v51  ;;  %v2287_v59 = vadd.f32 1.0, %v2884_v53  ;;  %v2188_v46 = vmax.f32 %v3419_v7, %v2156_v13 }
 0x2df   : > { %v2888_v61 = vpop.eup %2887  ;;  %v2354_v1 = vrot.slane %v2329_v42, %v3498_v8  ;;  %v2330_v47 = vadd.f32 %v2302_v55, %v2186_v54  ;;  %v2289_v2 = vadd.f32 1.0, %v2886_v56  ;;  %v2190_v53 = vmax.f32 %v3423_v11, %v2158_v15 }
 0x2e0   : > { %v2890_v4 = vpop.eup %2889  ;;  %v2350_v5 = vrot.slane %v2328_v57, %v3498_v8  ;;  %2907 = vlog2.f32 %v2287_v59  ;;  %v2288_v9 = vadd.f32 1.0, %v2888_v61  ;;  %v2407_v14 = vsub.f32 %v3384_v38, %v2346_v45 }
 0x2e1   : > { %v2358_v26 = vrot.slane %v2330_v47, %v3498_v8  ;;  %2909 = vlog2.f32 %v2289_v2  ;;  %v2290_v12 = vadd.f32 1.0, %v2890_v4  ;;  %v2409_v19 = vsub.f32 %v3387_v40, %v2354_v1 }
 0x2e2   : > { %v2408_v16 = vsub.f32 %v3391_v43, %v2350_v5  ;;  %2911 = vlog2.f32 %v2288_v9  ;;  %v2189_v43 = vmax.f32 %v3415_v3, %v2157_v10 }
 0x2e3   : > { %v2892_v18 = vpop.eup %2891  ;;  %v2410_v20 = vsub.f32 %v3395_v25, %v2358_v26  ;;  %2913 = vlog2.f32 %v2290_v12 }
 0x2e4   : > { %v2894_v63 = vpop.eup %2893  ;;  %v2439_v28 = vcombine.low %v2407_v14, %v2408_v16  ;;  %v2304_v38 = vmul.f32 0.6931472, %v2892_v18  ;;  %v2191_v18 = vmax.f32 %v3440_v62, %v2159_v31 }
 0x2e5   : > { %v2896_v39 = vpop.eup %2895  ;;  %v2440_v41 = vcombine.low %v2409_v19, %v2410_v20  ;;  %v2308_v0 = vmul.f32 0.6931472, %v2894_v63 }
 0x2e6   : > { %v2898_v44 = vpop.eup %2897  ;;  %v2447_v40 = vrot.slane %v2439_v28, %v3519_v17  ;;  %v2331_v25 = vadd.f32 %v2304_v38, %v2187_v33  ;;  %v2306_v48 = vmul.f32 0.6931472, %v2896_v39  ;;  %v2192_v33 = vmax.f32 %v3447_v32, %v2160_v49 }
 0x2e7   : > { %v2900_v51 = vpop.eup %2899  ;;  %v2454_v6 = vrot.slane %v2440_v41, %v3519_v17  ;;  %v2333_v52 = vadd.f32 %v2308_v0, %v2189_v43  ;;  %v2310_v10 = vmul.f32 0.6931472, %v2898_v44  ;;  %v2194_v41 = vmax.f32 %v3451_v37, %v2162_v50 }
 0x2e8   : > { %v2902_v42 = vpop.eup %2901  ;;  %v2362_v54 = vrot.slane %v2331_v25, %v3498_v8  ;;  %v2332_v55 = vadd.f32 %v2306_v48, %v2188_v46  ;;  %v2291_v56 = vadd.f32 1.0, %v2900_v51 }
 0x2e9   : > { %v2904_v45 = vpop.eup %2903  ;;  %v2455_v57 = vcombine.low %v2447_v40, %v2454_v6  ;;  %v2370_v58 = vrot.slane %v2333_v52, %v3498_v8  ;;  %v2334_v13 = vadd.f32 %v2310_v10, %v2190_v53  ;;  %v2293_v59 = vadd.f32 1.0, %v2902_v42 }
 0x2ea   : > { %v2906_v61 = vpop.eup %2905  ;;  %v2366_v1 = vrot.slane %v2332_v55, %v3498_v8  ;;  %2915 = vlog2.f32 %v2291_v56  ;;  %v2292_v47 = vadd.f32 1.0, %v2904_v45  ;;  %v2411_v4 = vsub.f32 %v3412_v60, %v2362_v54 }
 0x2eb   : > { %v2374_v2 = vrot.slane %v2334_v13, %v3498_v8  ;;  %2917 = vlog2.f32 %v2293_v59  ;;  %v2294_v15 = vadd.f32 1.0, %v2906_v61  ;;  %2511 = vst [vmem:[%s3542_s3] sm:$0xff] %v2455_v57  ;;  %v2413_v26 = vsub.f32 %v3415_v3, %v2370_v58 }
 0x2ec   : > { %v2412_v5 = vsub.f32 %v3419_v7, %v2366_v1  ;;  %2919 = vlog2.f32 %v2292_v47  ;;  %v2193_v60 = vmax.f32 %v3443_v27, %v2161_v36  ;;  %v2195_v42 = vmax.f32 %v3468_v21, %v2163_v29 }
 0x2ed   : > { %v2908_v9 = vpop.eup %2907  ;;  %v2414_v12 = vsub.f32 %v3423_v11, %v2374_v2  ;;  %2921 = vlog2.f32 %v2294_v15  ;;  %v2198_v59 = vmax.f32 %v3477_v24, %v2166_v35 }
 0x2ee   : > { %v2910_v14 = vpop.eup %2909  ;;  %v2456_v16 = vcombine.low %v2411_v4, %v2412_v5  ;;  %v2312_v19 = vmul.f32 0.6931472, %v2908_v9 }
 0x2ef   : > { %v2912_v20 = vpop.eup %2911  ;;  %v2457_v63 = vcombine.low %v2413_v26, %v2414_v12  ;;  %v2316_v7 = vmul.f32 0.6931472, %v2910_v14 }
 0x2f0   : > { %v2914_v28 = vpop.eup %2913  ;;  %v2464_v3 = vrot.slane %v2456_v16, %v3519_v17  ;;  %v2335_v11 = vadd.f32 %v2312_v19, %v2191_v18  ;;  %v2314_v38 = vmul.f32 0.6931472, %v2912_v20 }
 0x2f1   : > { %v2471_v31 = vrot.slane %v2457_v63, %v3519_v17  ;;  %v2337_v39 = vadd.f32 %v2316_v7, %v2193_v60  ;;  %v2318_v43 = vmul.f32 0.6931472, %v2914_v28 }
 0x2f2   : > { %v2378_v36 = vrot.slane %v2335_v11, %v3498_v8  ;;  %v2336_v0 = vadd.f32 %v2314_v38, %v2192_v33 }
 0x2f3   : > { %v2472_v44 = vcombine.low %v2464_v3, %v2471_v31  ;;  %v2386_v40 = vrot.slane %v2337_v39, %v3498_v8  ;;  %v2338_v25 = vadd.f32 %v2318_v43, %v2194_v41 }
 0x2f4   : > { %v2382_v46 = vrot.slane %v2336_v0, %v3498_v8  ;;  %v2415_v48 = vsub.f32 %v3440_v62, %v2378_v36  ;;  %v2197_v62 = vmax.f32 %v3471_v22, %v2165_v30 }
 0x2f5   : > { %v2390_v49 = vrot.slane %v2338_v25, %v3498_v8  ;;  %2512 = vst [vmem:[%s3542_s3 + $0x8] sm:$0xff] %v2472_v44  ;;  %v2417_v50 = vsub.f32 %v3443_v27, %v2386_v40 }
 0x2f6   : > { %v2416_v51 = vsub.f32 %v3447_v32, %v2382_v46 }
 0x2f7   : > { %v2916_v6 = vpop.eup %2915  ;;  %v2418_v52 = vsub.f32 %v3451_v37, %v2390_v49  ;;  %v2196_v37 = vmax.f32 %v3474_v23, %v2164_v34 }
 0x2f8   : > { %v2918_v53 = vpop.eup %2917  ;;  %v2473_v10 = vcombine.low %v2415_v48, %v2416_v51  ;;  %v2320_v54 = vmul.f32 0.6931472, %v2916_v6 }
 0x2f9   : > { %v2920_v55 = vpop.eup %2919  ;;  %v2474_v56 = vcombine.low %v2417_v50, %v2418_v52  ;;  %v2324_v45 = vmul.f32 0.6931472, %v2918_v53 }
 0x2fa   : > { %v2922_v32 = vpop.eup %2921  ;;  %v2481_v27 = vrot.slane %v2473_v10, %v3519_v17  ;;  %v2339_v57 = vadd.f32 %v2320_v54, %v2195_v42  ;;  %v2322_v58 = vmul.f32 0.6931472, %v2920_v55 }
 0x2fb   : > { %v2488_v29 = vrot.slane %v2474_v56, %v3519_v17  ;;  %v2341_v13 = vadd.f32 %v2324_v45, %v2197_v62  ;;  %v2326_v61 = vmul.f32 0.6931472, %v2922_v32 }
 0x2fc   : > { %v2394_v30 = vrot.slane %v2339_v57, %v3498_v8  ;;  %v2340_v1 = vadd.f32 %v2322_v58, %v2196_v37 }
 0x2fd   : > { %v2489_v47 = vcombine.low %v2481_v27, %v2488_v29  ;;  %v2402_v2 = vrot.slane %v2341_v13, %v3498_v8  ;;  %v2342_v15 = vadd.f32 %v2326_v61, %v2198_v59 }
 0x2fe   : > { %v2398_v34 = vrot.slane %v2340_v1, %v3498_v8  ;;  %v2419_v5 = vsub.f32 %v3468_v21, %v2394_v30 }
 0x2ff   : > { %v2406_v4 = vrot.slane %v2342_v15, %v3498_v8  ;;  %2513 = vst [vmem:[%s3542_s3 + $0x10] sm:$0xff] %v2489_v47  ;;  %v2421_v9 = vsub.f32 %v3471_v22, %v2402_v2 }
 0x300   : > { %v2420_v35 = vsub.f32 %v3474_v23, %v2398_v34 }
 0x301   : > { %v2422_v26 = vsub.f32 %v3477_v24, %v2406_v4 }
 0x302   : > { %v2490_v12 = vcombine.low %v2419_v5, %v2420_v35 }
 0x303   : > { %v2491_v14 = vcombine.low %v2421_v9, %v2422_v26 }
 0x304   : > { %v2498_v16 = vrot.slane %v2490_v12, %v3519_v17 }
 0x305   : > { %v2505_v18 = vrot.slane %v2491_v14, %v3519_v17 }
 0x307   : > { %v2506_v8 = vcombine.low %v2498_v16, %v2505_v18 }
 0x309   : > { %2514 = vst [vmem:[%s3542_s3 + $0x18] sm:$0xff] %v2506_v8 }
 0x30a   : > { %2964 = shalt.err (!%p2961_p10)
}
 0x30b   : > { %s2965_s23 = scalar_lea.hbm %s2528_s8, 512  ;;  %s2969_s26 = scalar_lea.hbm %s3636_s2, 1024 }
 0x30c   : > { %p2966_p2 = scmp.ne.s32.totalorder %s2528_s8, %s2965_s23  ;;  %p2970_p7 = scmp.lt.s32.totalorder %s2528_s8, %s3636_s2 }
 0x30d   : > { %p2971_p0 = scmp.lt.s32.totalorder %s2969_s26, %s2965_s23 }
 0x30e   : > { %p2967_p4 = pnand %p2966_p2, %p3647_p12 }
 0x30f   : > { %p2972_p6 = por %p2971_p0, %p2970_p7 }
 0x310   : > { %p2968_p9 = pneg %p2967_p4 }
 0x312   : > { %p2973_p11 = pnand %p2972_p6, %p2968_p9 }
 0x314   : > { %2976 = shalt.err (!%p2973_p11)
}
 0x315   : > { %2674 = dma.vmem_to_hbm [thread:$0]  (%p3647_p12), %s2531_s5, 512, %s2528_s8, %s2516_s14  }
 0x316 PF: > { %s2542_s20 = sand.u32 1, %s3003_s9   ;;  %p3648_p13 = scmp.ne.s32.totalorder %s3642_s22, 0 }
 0x317   : > { %p3649_p1 = scmp.ge.s32.totalorder %s3015_s12, 2  ;;  %s2543_s28 = scalar_lea.sflag [#allocation4], %s2542_s20 }
 0x319   : > { %p2681_p3 = pnand %p3649_p1, %p3648_p13 }
 0x31b   : > { %p2682_p5 = pneg %p2681_p3 }
 0x31d   : > { %2998 = dma.done.wait (%p2682_p5), %s2543_s28, 512  }
 0x31e   : > { %3000 = vsyncadd (%p2682_p5), %s2543_s28, 4294966784  ;;  %p15_p8 = scmp.ge.s32.totalorder %s3062_s15, 4   ;;  %s3650_s9 = smov %s3007_s10 }
 0x31f   : > { %s3651_s10 = smov %s3011_s11  ;;  %s3652_s11 = smov %s3074_s18 }
 0x320   : > { %s3653_s12 = smov %s3062_s15  ;;  %17 = sbr.rel (!%p15_p8) target bundleno = 5 (0x5), region = 73 }
 0x325   :  { %2548 = vsyncpa [#allocation3], 1 }
 0x326   :  { %2550 = vsyncpa [#allocation3 + $0x1], 1 }
 0x327   :  { %2551 = vsyncpa [#allocation4], 1 }
 0x328   :  { %2553 = vsyncpa [#allocation4 + $0x1], 1 }

</bundles_post_ra>
